<compile_context>
chip_gen: v5e
topology: v5e:2x2
jax: 0.10.0
libtpu: 0.0.40
codegen_flags: <defaults>
</compile_context>

<pallas_src>
import functools

import jax
import jax.numpy as jnp
from jax import lax
from jax.experimental import pallas as pl
from jax.experimental.pallas import tpu as pltpu


def _round_up(x: int, m: int) -> int:
    return -(-x // m) * m


def _gram_kernel(x_ref, gram_ref, rowsum_ref, *, n_valid, tn, tiles_per_core):
    """Accumulate a partial Gram (B,B) and row-sums (B,1) for one core's N-slice.

    x_ref:      (B, tn) input tile in native dtype.
    gram_ref:   (B, B) f32 output block, resident across the reduction axis.
    rowsum_ref: (B, 1) f32 output block, resident across the reduction axis.
    """
    c = pl.program_id(0)          # core split ("parallel")
    n = pl.program_id(1)          # N-tile reduction ("arbitrary")
    tile_idx = c * tiles_per_core + n
    start = tile_idx * tn
    rem = n_valid - start         # number of valid lanes in this tile (<=0 -> none)

    @pl.when(n == 0)
    def _init():
        gram_ref[...] = jnp.zeros_like(gram_ref)
        rowsum_ref[...] = jnp.zeros_like(rowsum_ref)

    def _accumulate(xt):
        # Gram accumulation on the MXU: G += x @ x^T with f32 accumulation.
        # (contracting dims ((1,),(1,)) == the q@k^T pattern the MXU consumes
        # directly; no materialized transpose of the (B, tn) tile expected.)
        gram_ref[...] += lax.dot_general(
            xt, xt,
            dimension_numbers=(((1,), (1,)), ((), ())),
            preferred_element_type=jnp.float32)
        # f32 accumulation without an explicit upcast copy of the tile.
        rowsum_ref[...] += jnp.sum(xt, axis=1, keepdims=True, dtype=jnp.float32)

    @pl.when(rem >= tn)
    def _full_tile():
        _accumulate(x_ref[...])

    @pl.when(rem < tn)
    def _ragged_tile():
        # Partial (or fully clamped-duplicate) tile: zero out-of-range lanes
        # before both the dot and the row-sum -- OOB lanes are not zeros.
        x = x_ref[...]
        col = lax.broadcasted_iota(jnp.int32, x.shape, 1)
        x = jnp.where(col < rem, x, jnp.zeros_like(x))
        _accumulate(x)


def attention_regularization_loss(attention_maps,
                                  sparsity_weight=0.01,
                                  diversity_weight=0.01,
                                  *,
                                  max_tile_bytes=4 << 20):
    """attention_maps: (B, 1, H, W) -> scalar f32 loss (matches the PyTorch module)."""
    B = attention_maps.shape[0]
    x2d = attention_maps.reshape(B, -1)            # (B, N), native dtype, no pad/copy
    N = x2d.shape[1]
    itemsize = jnp.dtype(x2d.dtype).itemsize

    # Lane-dense tile width: multiple of 128, ~max_tile_bytes per tile so the
    # HBM stream amortizes per-grid-step overhead; capped by the padded width.
    tn = max(128, (max_tile_bytes // max(B * itemsize, 1)) // 128 * 128)
    n_lane = _round_up(N, 128)
    tn = min(tn, n_lane)
    tiles_total = -(-n_lane // tn)

    # Leading "parallel" axis: 2-way TensorCore split of the N reduction on
    # v7x; degenerates to a sequential 2-iteration loop on single-TC chips.
    num_cores = 1 if tiles_total < 2 else 2
    tiles_per_core = -(-tiles_total // num_cores)

    def x_index_map(c, n):
        idx = c * tiles_per_core + n
        # Clamp so the DMA never targets a fully out-of-range block; the kernel
        # masks the duplicated / ragged lanes to zero.
        return (0, jnp.minimum(idx, tiles_total - 1))

    gram_parts, rowsum_parts = pl.pallas_call(
        functools.partial(_gram_kernel, n_valid=N, tn=tn,
                          tiles_per_core=tiles_per_core),
        out_shape=(jax.ShapeDtypeStruct((num_cores, B, B), jnp.float32),
                   jax.ShapeDtypeStruct((num_cores, B, 1), jnp.float32)),
        grid_spec=pltpu.PrefetchScalarGridSpec(
            num_scalar_prefetch=0,
            grid=(num_cores, tiles_per_core),
            in_specs=[pl.BlockSpec((B, tn), x_index_map)],
            out_specs=(pl.BlockSpec((None, B, B), lambda c, n: (c, 0, 0)),
                       pl.BlockSpec((None, B, 1), lambda c, n: (c, 0, 0)))),
        compiler_params=pltpu.CompilerParams(
            dimension_semantics=("parallel", "arbitrary"),
            vmem_limit_bytes=32 << 20),
    )(x2d)

    # ---- tiny O(B^2) finalize in plain JAX (combines per-core partials) ----
    gram = jnp.sum(gram_parts, axis=0)             # (B, B) == X @ X^T in f32
    rowsum = jnp.sum(rowsum_parts, axis=0)         # (B, 1)

    sparsity_loss = jnp.sum(rowsum) / jnp.float32(B)

    eps = jnp.float32(1e-8)
    sq = jnp.diagonal(gram)                        # ||x_i||^2
    norms = jnp.sqrt(sq)
    # torch F.cosine_similarity clamp: denom = max(||x_i||*||x_j||, eps)
    denom = jnp.maximum(norms[:, None] * norms[None, :], eps)
    sims = gram / denom
    off_diag = ~jnp.eye(B, dtype=bool)
    # NOTE: B == 1 divides by zero (NaN), matching torch.mean of an empty selection.
    diversity_loss = jnp.sum(jnp.where(off_diag, sims, 0.0)) / jnp.float32(B * (B - 1))

    return (jnp.float32(sparsity_weight) * sparsity_loss
            + jnp.float32(diversity_weight) * diversity_loss)


def _reference(attention_maps, sparsity_weight=0.01, diversity_weight=0.01):
    """Pure-JAX reference matching the PyTorch module."""
    B = attention_maps.shape[0]
    flat = attention_maps.reshape(B, -1).astype(jnp.float32)
    sparsity = jnp.mean(jnp.sum(flat, axis=1))
    eps = 1e-8
    norms = jnp.linalg.norm(flat, axis=1, keepdims=True)          # (B, 1)
    denom = jnp.maximum(norms * norms.T, eps)
    sims = jnp.dot(flat, flat.T, precision=lax.Precision.HIGHEST) / denom
    mask = ~jnp.eye(B, dtype=bool)
    diversity = jnp.sum(jnp.where(mask, sims, 0.0)) / (B * (B - 1))
    return sparsity_weight * sparsity + diversity_weight * diversity


if __name__ == "__main__":
    key = jax.random.PRNGKey(0)

    # Case 1: (B,1,H,W) = (4,1,16,16) -> N = 256, single aligned tile, 1 core.
    B, C, H, W = 4, 1, 16, 16
    attn = jax.nn.sigmoid(jax.random.normal(key, (B, C, H, W), dtype=jnp.float32))
    loss = jax.block_until_ready(attention_regularization_loss(attn))
    ref = jax.block_until_ready(_reference(attn))
    assert jnp.allclose(loss, ref, rtol=1e-4, atol=1e-6), (loss, ref)

    # Case 2: ragged N (576, not 128-aligned), multiple tiles, 2-way core split
    # (tiny max_tile_bytes forces the multi-tile / masked-tail / clamped paths).
    B2, H2, W2 = 2, 24, 24
    attn2 = jax.nn.sigmoid(
        jax.random.normal(jax.random.PRNGKey(0), (B2, 1, H2, W2), dtype=jnp.float32))
    loss2 = jax.block_until_ready(
        attention_regularization_loss(attn2, max_tile_bytes=2048))
    ref2 = jax.block_until_ready(_reference(attn2))
    assert jnp.allclose(loss2, ref2, rtol=1e-4, atol=1e-6), (loss2, ref2)

    print("KERNEL_OK")
</pallas_src>

<mosaic_0001>
module attributes {stable_mosaic.version = 11 : i64} {
  func.func @_gram_kernel(%arg0: i32, %arg1: i32, %arg2: memref<4x256xf32, #tpu.memory_space<vmem>>, %arg3: memref<1x4x4xf32, #tpu.memory_space<vmem>>, %arg4: memref<1x4x1xf32, #tpu.memory_space<vmem>>) attributes {dimension_semantics = [#tpu.dimension_semantics<parallel>, #tpu.dimension_semantics<arbitrary>], iteration_bounds = array<i64: 1, 1>, scalar_prefetch = 0 : i64, scratch_operands = 0 : i64, tpu.core_type = #tpu.core_type<tc>, window_params = [{transform_indices = @transform_0, window_bounds = array<i64: 4, 256>}, {transform_indices = @transform_1, window_bounds = array<i64: 1, 4, 4>}, {transform_indices = @transform_2, window_bounds = array<i64: 1, 4, 1>}]} {
    %c1_i32 = arith.constant 1 : i32
    %0 = arith.muli %arg0, %c1_i32 : i32
    %1 = arith.addi %0, %arg1 : i32
    %c256_i32 = arith.constant 256 : i32
    %2 = arith.muli %1, %c256_i32 : i32
    %c256_i32_0 = arith.constant 256 : i32
    %3 = arith.subi %c256_i32_0, %2 : i32
    %c0_i32 = arith.constant 0 : i32
    %4 = arith.cmpi eq, %arg1, %c0_i32 : i32
    %5 = arith.extui %4 : i1 to i32
    %c0_i32_1 = arith.constant 0 : i32
    %6 = arith.cmpi ne, %5, %c0_i32_1 : i32
    scf.if %6 {
      %cst = arith.constant 0.000000e+00 : f32
      %13 = vector.broadcast %cst : f32 to vector<4x4xf32>
      %c0 = arith.constant 0 : index
      %c0_6 = arith.constant 0 : index
      %c0_7 = arith.constant 0 : index
      %14 = vector.load %arg3[%c0, %c0_6, %c0_7] : memref<1x4x4xf32, #tpu.memory_space<vmem>>, vector<1x4x4xf32>
      %15 = vector.shape_cast %14 : vector<1x4x4xf32> to vector<4x4xf32>
      %16 = vector.shape_cast %13 : vector<4x4xf32> to vector<1x4x4xf32>
      tpu.vector_store %arg3[%c0, %c0_6, %c0_7], %16 {strides = array<i32>} : memref<1x4x4xf32, #tpu.memory_space<vmem>>, vector<1x4x4xf32>,
      %cst_8 = arith.constant 0.000000e+00 : f32
      %17 = vector.broadcast %cst_8 : f32 to vector<4x1xf32>
      %c0_9 = arith.constant 0 : index
      %c0_10 = arith.constant 0 : index
      %c0_11 = arith.constant 0 : index
      %18 = vector.load %arg4[%c0_9, %c0_10, %c0_11] : memref<1x4x1xf32, #tpu.memory_space<vmem>>, vector<1x4x1xf32>
      %19 = vector.shape_cast %18 : vector<1x4x1xf32> to vector<4x1xf32>
      %20 = vector.shape_cast %17 : vector<4x1xf32> to vector<1x4x1xf32>
      tpu.vector_store %arg4[%c0_9, %c0_10, %c0_11], %20 {strides = array<i32>} : memref<1x4x1xf32, #tpu.memory_space<vmem>>, vector<1x4x1xf32>,
    } else {
    }
    %c256_i32_2 = arith.constant 256 : i32
    %7 = arith.cmpi sge, %3, %c256_i32_2 : i32
    %8 = arith.extui %7 : i1 to i32
    %c0_i32_3 = arith.constant 0 : i32
    %9 = arith.cmpi ne, %8, %c0_i32_3 : i32
    scf.if %9 {
      %c0 = arith.constant 0 : index
      %c0_6 = arith.constant 0 : index
      %13 = vector.load %arg2[%c0, %c0_6] : memref<4x256xf32, #tpu.memory_space<vmem>>, vector<4x256xf32>
      %c0_7 = arith.constant 0 : index
      %c0_8 = arith.constant 0 : index
      %c0_9 = arith.constant 0 : index
      %14 = vector.load %arg3[%c0_7, %c0_8, %c0_9] : memref<1x4x4xf32, #tpu.memory_space<vmem>>, vector<1x4x4xf32>
      %15 = vector.shape_cast %14 : vector<1x4x4xf32> to vector<4x4xf32>
      %cst = arith.constant dense<0.000000e+00> : vector<4x4xf32>
      %16 = tpu.matmul %13, %13, %cst {dimension_numbers = #tpu.dot_dimension_numbers<[1], [1], [0], [0], [0, 0, 1, 0], [], []>} : vector<4x256xf32>, vector<4x256xf32>, vector<4x4xf32> -> vector<4x4xf32>
      %17 = arith.addf %15, %16 : vector<4x4xf32>
      %c0_10 = arith.constant 0 : index
      %c0_11 = arith.constant 0 : index
      %c0_12 = arith.constant 0 : index
      %18 = vector.load %arg3[%c0_10, %c0_11, %c0_12] : memref<1x4x4xf32, #tpu.memory_space<vmem>>, vector<1x4x4xf32>
      %19 = vector.shape_cast %18 : vector<1x4x4xf32> to vector<4x4xf32>
      %20 = vector.shape_cast %17 : vector<4x4xf32> to vector<1x4x4xf32>
      tpu.vector_store %arg3[%c0_10, %c0_11, %c0_12], %20 {strides = array<i32>} : memref<1x4x4xf32, #tpu.memory_space<vmem>>, vector<1x4x4xf32>,
      %c0_13 = arith.constant 0 : index
      %c0_14 = arith.constant 0 : index
      %c0_15 = arith.constant 0 : index
      %21 = vector.load %arg4[%c0_13, %c0_14, %c0_15] : memref<1x4x1xf32, #tpu.memory_space<vmem>>, vector<1x4x1xf32>
      %22 = vector.shape_cast %21 : vector<1x4x1xf32> to vector<4x1xf32>
      %cst_16 = arith.constant dense<0.000000e+00> : vector<4xf32>
      %23 = vector.multi_reduction <add>, %13, %cst_16 [1] : vector<4x256xf32> to vector<4xf32>
      %24 = vector.shape_cast %23 : vector<4xf32> to vector<4x1xf32>
      %25 = arith.addf %22, %24 : vector<4x1xf32>
      %c0_17 = arith.constant 0 : index
      %c0_18 = arith.constant 0 : index
      %c0_19 = arith.constant 0 : index
      %26 = vector.load %arg4[%c0_17, %c0_18, %c0_19] : memref<1x4x1xf32, #tpu.memory_space<vmem>>, vector<1x4x1xf32>
      %27 = vector.shape_cast %26 : vector<1x4x1xf32> to vector<4x1xf32>
      %28 = vector.shape_cast %25 : vector<4x1xf32> to vector<1x4x1xf32>
      tpu.vector_store %arg4[%c0_17, %c0_18, %c0_19], %28 {strides = array<i32>} : memref<1x4x1xf32, #tpu.memory_space<vmem>>, vector<1x4x1xf32>,
    } else {
    }
    %c256_i32_4 = arith.constant 256 : i32
    %10 = arith.cmpi slt, %3, %c256_i32_4 : i32
    %11 = arith.extui %10 : i1 to i32
    %c0_i32_5 = arith.constant 0 : i32
    %12 = arith.cmpi ne, %11, %c0_i32_5 : i32
    scf.if %12 {
      %c0 = arith.constant 0 : index
      %c0_6 = arith.constant 0 : index
      %13 = vector.load %arg2[%c0, %c0_6] : memref<4x256xf32, #tpu.memory_space<vmem>>, vector<4x256xf32>
      %14 = tpu.iota {dimensions = array<i32: 1>} : vector<4x256xi32>
      %15 = vector.broadcast %3 : i32 to vector<4x256xi32>
      %16 = arith.cmpi slt, %14, %15 : vector<4x256xi32>
      %cst = arith.constant 0.000000e+00 : f32
      %17 = vector.broadcast %cst : f32 to vector<4x256xf32>
      %18 = arith.select %16, %13, %17 : vector<4x256xi1>, vector<4x256xf32>
      %c0_7 = arith.constant 0 : index
      %c0_8 = arith.constant 0 : index
      %c0_9 = arith.constant 0 : index
      %19 = vector.load %arg3[%c0_7, %c0_8, %c0_9] : memref<1x4x4xf32, #tpu.memory_space<vmem>>, vector<1x4x4xf32>
      %20 = vector.shape_cast %19 : vector<1x4x4xf32> to vector<4x4xf32>
      %cst_10 = arith.constant dense<0.000000e+00> : vector<4x4xf32>
      %21 = tpu.matmul %18, %18, %cst_10 {dimension_numbers = #tpu.dot_dimension_numbers<[1], [1], [0], [0], [0, 0, 1, 0], [], []>} : vector<4x256xf32>, vector<4x256xf32>, vector<4x4xf32> -> vector<4x4xf32>
      %22 = arith.addf %20, %21 : vector<4x4xf32>
      %c0_11 = arith.constant 0 : index
      %c0_12 = arith.constant 0 : index
      %c0_13 = arith.constant 0 : index
      %23 = vector.load %arg3[%c0_11, %c0_12, %c0_13] : memref<1x4x4xf32, #tpu.memory_space<vmem>>, vector<1x4x4xf32>
      %24 = vector.shape_cast %23 : vector<1x4x4xf32> to vector<4x4xf32>
      %25 = vector.shape_cast %22 : vector<4x4xf32> to vector<1x4x4xf32>
      tpu.vector_store %arg3[%c0_11, %c0_12, %c0_13], %25 {strides = array<i32>} : memref<1x4x4xf32, #tpu.memory_space<vmem>>, vector<1x4x4xf32>,
      %c0_14 = arith.constant 0 : index
      %c0_15 = arith.constant 0 : index
      %c0_16 = arith.constant 0 : index
      %26 = vector.load %arg4[%c0_14, %c0_15, %c0_16] : memref<1x4x1xf32, #tpu.memory_space<vmem>>, vector<1x4x1xf32>
      %27 = vector.shape_cast %26 : vector<1x4x1xf32> to vector<4x1xf32>
      %cst_17 = arith.constant dense<0.000000e+00> : vector<4xf32>
      %28 = vector.multi_reduction <add>, %18, %cst_17 [1] : vector<4x256xf32> to vector<4xf32>
      %29 = vector.shape_cast %28 : vector<4xf32> to vector<4x1xf32>
      %30 = arith.addf %27, %29 : vector<4x1xf32>
      %c0_18 = arith.constant 0 : index
      %c0_19 = arith.constant 0 : index
      %c0_20 = arith.constant 0 : index
      %31 = vector.load %arg4[%c0_18, %c0_19, %c0_20] : memref<1x4x1xf32, #tpu.memory_space<vmem>>, vector<1x4x1xf32>
      %32 = vector.shape_cast %31 : vector<1x4x1xf32> to vector<4x1xf32>
      %33 = vector.shape_cast %30 : vector<4x1xf32> to vector<1x4x1xf32>
      tpu.vector_store %arg4[%c0_18, %c0_19, %c0_20], %33 {strides = array<i32>} : memref<1x4x1xf32, #tpu.memory_space<vmem>>, vector<1x4x1xf32>,
    } else {
    }
    return
  }
  func.func @transform_0(%arg0: i32, %arg1: i32) -> (i32, i32) {
    %c1_i32 = arith.constant 1 : i32
    %0 = arith.muli %arg0, %c1_i32 : i32
    %1 = arith.addi %0, %arg1 : i32
    %c0_i32 = arith.constant 0 : i32
    %2 = arith.minsi %1, %c0_i32 : i32
    %c0_i32_0 = arith.constant 0 : i32
    %c0_i32_1 = arith.constant 0 : i32
    return %c0_i32_0, %2 : i32, i32
  }
  func.func @transform_1(%arg0: i32, %arg1: i32) -> (i32, i32, i32) {
    %c0_i32 = arith.constant 0 : i32
    %c0_i32_0 = arith.constant 0 : i32
    %c0_i32_1 = arith.constant 0 : i32
    return %arg0, %c0_i32, %c0_i32_0 : i32, i32, i32
  }
  func.func @transform_2(%arg0: i32, %arg1: i32) -> (i32, i32, i32) {
    %c0_i32 = arith.constant 0 : i32
    %c0_i32_0 = arith.constant 0 : i32
    %c0_i32_1 = arith.constant 0 : i32
    return %arg0, %c0_i32, %c0_i32_0 : i32, i32, i32
  }
}

</mosaic_0001>

<bundles_post_ra>
// kernel: tpu_custom_call.1
= control target key start
LH: loop header
LB: loop body
LE: loop exit
PB: predicated region body
PF: predicated region fallthrough
CT: control target
= control target key end

     0   :  { %8 = vsyncpa [#allocation3], 0  ;;  %s307_s0 = inlined_call_operand.hbm [shape: f32[4,256], index: 0, kind: input, shape index: {}]   ;;  %s308_s1 = inlined_call_operand.hbm [shape: f32[1,4,4], index: 1, kind: output, shape index: {0}]   ;;  %s309_s2 = inlined_call_operand.vmem [shape: f32[1,4,1], index: 2, kind: output, shape index: {1}]  }
   0x1   :  { %9 = vsyncpa [#allocation4], 0  ;;  %s21_s11 = sshll.u32 %s307_s0, 4  ;;  %s272_s12 = smov [#allocation2]   ;;  %s22_s11 = int_to_ptr.hbm [resolvable:$true] %s21_s11 }
   0x2   :  { %s23_s13 = sshll.u32 %s272_s12, 4  ;;  %s24_s13 = int_to_ptr.vmem [resolvable:$true] %s23_s13 }
   0x3   :  { %26 = dma.hbm_to_vmem [thread:$0]  %s22_s11, 128, %s24_s13, [#allocation3]  }
   0x4   :  { %268 = dma.done.wait [#allocation3], 128  }
   0x5   :  { %269 = vsyncadd [#allocation3], 4294967168  ;;  %v50_v0 = vld [vmem:[#allocation2] sm:$0xff]  ;;  %vm112_vm0 = vcmask 1043456   ;;  %vm42_vm1 = vcmask 27648   ;;  %v273_v10 = vmov 0.0  }
   0x6   :  { %53 = vst [vmem:[#allocation1] ss:$2 sm:$0xff] %v50_v0  ;;  %vm44_vm2 = vcmask 3072   ;;  %s274_s17 = smov [#allocation5]   ;;  %s201_s21 = sshll.u32 %s308_s1, 4  ;;  %s202_s21 = int_to_ptr.hbm [resolvable:$true] %s201_s21 }
   0x7   :  { %43 = vst.msk [vmem:[#allocation5] sm:$0xf] %vm42_vm1, %v273_v10  ;;  %s199_s18 = sshll.u32 %s274_s17, 4  ;;  %s200_s18 = int_to_ptr.vmem [resolvable:$true] %s199_s18 }
   0x8   :  { %45 = vst.msk [vmem:[%s309_s2] sm:$0xf] %vm44_vm2, %v273_v10 }
   0xd   :  { %v54_v1 = vld.sshfl [vmem:[#allocation1] sm:$0xff pattern:$0x75316420]  ;;  %v55_v2 = vld.sshfl [vmem:[#allocation1 + $0x8] sm:$0xff pattern:$0x75316420] }
   0xe   :  { %58 = vst [vmem:[#allocation1] ss:$2 sm:$0xff] %v50_v0  ;;  %v51_v15 = vld [vmem:[#allocation5] sm:$0xf] }
   0xf   :  { %v106_v11 = vld [vmem:[%s309_s2] sm:$0xf] }
  0x15   :  { %v59_v3 = vld.sshfl [vmem:[#allocation1] sm:$0xff pattern:$0x75316420]  ;;  %v60_v4 = vld.sshfl [vmem:[#allocation1 + $0x8] sm:$0xff pattern:$0x75316420] }
  0x16   :  { %78 = vmatpush.xpose.msra.mxu0 %v59_v3  ;;  %98 = vmatpush.xpose.msra.mxu1 %v60_v4  ;;  %107 = vst [vmem:[#allocation1] ss:$2 sm:$0xff] %v50_v0 }
  0x19   :  { %79 = vmatmul.f32.vlgmr.msra.gmra.mxu0 %v54_v1  ;;  %99 = vmatmul.f32.vlgmr.msra.gmra.mxu1 %v55_v2 }
  0x1d   :  { %v108_v5 = vld.sshfl [vmem:[#allocation1] sm:$0xff pattern:$0x75316420]  ;;  %v109_v6 = vld.sshfl [vmem:[#allocation1 + $0x8] sm:$0xff pattern:$0x75316420] }
  0x1e   :  { %v113_v7 = vsel %vm112_vm0, %v108_v5, 0.0  ;;  %v114_v8 = vsel %vm112_vm0, %v109_v6, 0.0 }
  0x1f   :  { %v115_v9 = vadd.f32 %v114_v8, %v113_v7 }
  0x21   :  { %116 = vadd.xlane.f32.xlu0 %v115_v9 }
  0x94   :  { %v117_v12 = vpop.xlane.xlu0 %116 }
  0x95   :  { %v118_v13 = vadd.f32 %v117_v12, %v106_v11 }
  0x96   :  { %v80_v14 = vpop.f32.mrf.mxu0  ;;  %v100_v16 = vpop.f32.mrf.mxu1 }
  0x97   :  { %v101_v17 = vadd.f32 %v100_v16, %v80_v14  ;;  %120 = vst.msk [vmem:[%s309_s2] sm:$0xf] %vm44_vm2, %v118_v13 }
  0x99   :  { %v103_v18 = vadd.f32 %v101_v17, %v51_v15 }
  0x9b   :  { %105 = vst.msk [vmem:[#allocation5] sm:$0xf] %vm42_vm1, %v103_v18 }
  0x9c   :  { %204 = dma.vmem_to_hbm [thread:$0]  %s200_s18, 64, %s202_s21, [#allocation4]  }
  0x9d   :  { %270 = dma.done.wait [#allocation4], 64  }
  0x9e   :  { %271 = vsyncadd [#allocation4], 4294967232 }
  0x9f   :  { %213 = vsyncpa [#allocation3], 1 }
  0xa0   :  { %214 = vsyncpa [#allocation4], 1 }

</bundles_post_ra>
